<compile_context>
chip_gen: v6e
topology: v6e:2x2x1
jax: 0.10.0
libtpu: 0.0.40
codegen_flags: <defaults>
</compile_context>

<pallas_src>
import jax
import jax.numpy as jnp
from jax.experimental import pallas as pl
from jax.experimental.pallas import tpu as pltpu


# --------------------------------------------------------------------------
# kernels
# --------------------------------------------------------------------------
def _tile_contrib(x_ref, w1_ref, w3_ref, w2_ref):
    """Per (token-tile, hidden-tile) partial FFN output, f32."""
    x = x_ref[...]
    # Two MXU passes sharing the same LHS (same FLOPs as a fused [W1|W3] op).
    h1 = jnp.dot(x, w1_ref[...], preferred_element_type=jnp.float32)
    h3 = jnp.dot(x, w3_ref[...], preferred_element_type=jnp.float32)
    # SiLU(h1) * h3 — sigmoid lowers to the EUP slot, ~free next to the MXU.
    gated = (h1 * jax.nn.sigmoid(h1)) * h3
    # Second matmul in the weight dtype (bf16-native when weights are bf16),
    # accumulation stays f32.
    return jnp.dot(gated.astype(w2_ref.dtype), w2_ref[...],
                   preferred_element_type=jnp.float32)


def ffn_kernel_direct(x_ref, w1_ref, w3_ref, w2_ref, o_ref):
    """f32 output: accumulate directly into the resident output block."""
    h = pl.program_id(1)
    contrib = _tile_contrib(x_ref, w1_ref, w3_ref, w2_ref)

    @pl.when(h == 0)
    def _():
        o_ref[...] = contrib

    @pl.when(h != 0)
    def _():
        o_ref[...] += contrib


def ffn_kernel_scratch(x_ref, w1_ref, w3_ref, w2_ref, o_ref, acc_ref):
    """Non-f32 output: f32 scratch accumulator, single cast at the end."""
    h = pl.program_id(1)

    @pl.when(h == 0)
    def _():
        acc_ref[...] = jnp.zeros_like(acc_ref)

    acc_ref[...] += _tile_contrib(x_ref, w1_ref, w3_ref, w2_ref)

    @pl.when(h == pl.num_programs(1) - 1)
    def _():
        # Dropout has p=0.0 in the reference module -> identity.
        o_ref[...] = acc_ref[...].astype(o_ref.dtype)


# --------------------------------------------------------------------------
# wrapper helpers
# --------------------------------------------------------------------------
def _round_up(v, m):
    return ((v + m - 1) // m) * m


def _maybe_pad(a, shape):
    if tuple(a.shape) == tuple(shape):
        return a
    return jnp.pad(a, [(0, s - d) for d, s in zip(a.shape, shape)])


def _pick_th(Hp, target):
    """Largest multiple of 128 dividing Hp and <= target (Hp % 128 == 0)."""
    best = 128
    t = 128
    while t <= min(target, Hp):
        if Hp % t == 0:
            best = t
        t += 128
    return best


def _tpu_vmem_and_kind():
    kind = ""
    try:
        kind = jax.devices()[0].device_kind.lower()
    except Exception:
        pass
    vmem = None
    try:
        vmem = int(pltpu.get_tpu_info().vmem_capacity_bytes)
    except Exception:
        vmem = None
    if vmem is None:
        if "v7" in kind:
            vmem = 64 * 1024 * 1024
        elif kind:
            vmem = 128 * 1024 * 1024          # v5e / v6e
        else:
            vmem = 64 * 1024 * 1024           # unknown -> conservative
    return vmem, kind


def _footprint(tm, th, Dp, bx, bw, bo, use_scratch):
    f = 2 * tm * Dp * bx            # x tile, double buffered
    f += 2 * Dp * th * bw * 2       # w1 + w3 tiles, double buffered
    f += 2 * th * Dp * bw           # w2 tile, double buffered
    f += 2 * tm * Dp * bo           # output block
    f += 3 * tm * th * 4            # h1 / h3 / gated f32 temporaries
    if use_scratch:
        f += tm * Dp * 4            # f32 accumulator scratch
    return f


# --------------------------------------------------------------------------
# public entry point
# --------------------------------------------------------------------------
def feed_forward_block(x, w1, w3, w2, *, tm=512, th=512):
    """SwiGLU FFN. x: (B, S, D); w1, w3: (D, H); w2: (H, D).

    Weights are stored as (in_dim, out_dim), i.e. the transpose of the
    corresponding nn.Linear weight.
    """
    B, S, D = x.shape
    H = w1.shape[1]
    assert w1.shape == (D, H) and w3.shape == (D, H) and w2.shape == (H, D)

    M = B * S
    x2d = x.reshape(M, D)

    out_dtype = x.dtype
    bx = jnp.dtype(x.dtype).itemsize
    bw = jnp.dtype(w1.dtype).itemsize
    bo = jnp.dtype(out_dtype).itemsize
    use_scratch = jnp.dtype(out_dtype) != jnp.dtype(jnp.float32)

    # Sublane packing multiple for the activation dtype (8 f32 / 16 bf16 / 32 i8).
    sub = max(8, 32 // bx)

    vmem_cap, kind = _tpu_vmem_and_kind()
    is_v7 = "v7" in kind

    # ---- lane-dense padding targets (no extra hidden padding beyond 128).
    Dp = _round_up(D, 128)
    Hp = _round_up(H, 128)

    # ---- token tile: clamp to M, round to sublane packing.
    tm = max(sub, min(tm, _round_up(M, sub)))
    tm = _round_up(tm, sub)
    # On 2-TC chips keep >= 2 token tiles so both cores get work.
    if is_v7 and M >= 2 * sub and _round_up(M, tm) // tm < 2:
        tm = _round_up(-(-M // 2), sub)

    # ---- hidden tile: multiple of 128 dividing Hp.
    th = _pick_th(Hp, max(128, th))

    # ---- shrink tiles until the footprint fits the VMEM budget.
    budget = int(0.88 * vmem_cap)
    while _footprint(tm, th, Dp, bx, bw, bo, use_scratch) > budget and th > 128:
        th = _pick_th(Hp, th - 128)
    while _footprint(tm, th, Dp, bx, bw, bo, use_scratch) > budget and tm > sub:
        tm = _round_up(max(sub, tm // 2), sub)

    Mp = _round_up(M, tm)
    nh = Hp // th

    # ---- pad only when needed (aligned production shapes pay nothing here).
    x_p = _maybe_pad(x2d, (Mp, Dp))
    w1_p = _maybe_pad(w1, (Dp, Hp))
    w3_p = _maybe_pad(w3, (Dp, Hp))
    w2_p = _maybe_pad(w2, (Hp, Dp))

    need = _footprint(tm, th, Dp, bx, bw, bo, use_scratch)
    vmem_limit = int(min(0.92 * vmem_cap,
                         max(1.25 * need, 32 * 1024 * 1024)))

    kernel = ffn_kernel_scratch if use_scratch else ffn_kernel_direct
    scratch = [pltpu.VMEM((tm, Dp), jnp.float32)] if use_scratch else []

    n_token_tiles = Mp // tm
    cost = pl.CostEstimate(
        flops=6 * M * D * H + 4 * M * H,
        transcendentals=M * H,
        bytes_accessed=n_token_tiles * 3 * Dp * Hp * bw + Mp * Dp * (bx + bo),
    )

    out_p = pl.pallas_call(
        kernel,
        out_shape=jax.ShapeDtypeStruct((Mp, Dp), out_dtype),
        grid_spec=pltpu.PrefetchScalarGridSpec(
            num_scalar_prefetch=0,
            grid=(n_token_tiles, nh),                          # reduction last
            in_specs=[
                pl.BlockSpec((tm, Dp), lambda i, h: (i, 0)),   # x tile
                pl.BlockSpec((Dp, th), lambda i, h: (0, h)),   # W1 tile
                pl.BlockSpec((Dp, th), lambda i, h: (0, h)),   # W3 tile
                pl.BlockSpec((th, Dp), lambda i, h: (h, 0)),   # W2 tile
            ],
            out_specs=pl.BlockSpec((tm, Dp), lambda i, h: (i, 0)),
            scratch_shapes=scratch,
        ),
        compiler_params=pltpu.CompilerParams(
            dimension_semantics=("parallel", "arbitrary"),
            vmem_limit_bytes=vmem_limit,
        ),
        cost_estimate=cost,
    )(x_p, w1_p, w3_p, w2_p)

    return out_p[:M, :D].reshape(B, S, D)


# --------------------------------------------------------------------------
# reference + tests
# --------------------------------------------------------------------------
def reference(x, w1, w3, w2):
    h1 = x @ w1
    h3 = x @ w3
    return ((h1 * jax.nn.sigmoid(h1)) * h3) @ w2   # dropout(p=0.0) == identity


if __name__ == "__main__":
    # d_model=128 -> hidden=512 (lane-dense), batch=2, seq=64 -> 128 tokens.
    B, S, D = 2, 64, 128
    H = 4 * D

    key = jax.random.PRNGKey(0)
    kx, k1, k2, k3 = jax.random.split(key, 4)

    x = jax.random.normal(kx, (B, S, D), dtype=jnp.float32)
    # Weights stored as (in, out), i.e. the transpose of the nn.Linear weight.
    w1 = jax.random.normal(k1, (D, H), dtype=jnp.float32) * (1.0 / D ** 0.5)
    w3 = jax.random.normal(k3, (D, H), dtype=jnp.float32) * (1.0 / D ** 0.5)
    w2 = jax.random.normal(k2, (H, D), dtype=jnp.float32) * (1.0 / H ** 0.5)

    # th=128 -> 4 hidden tiles, exercising the accumulate / direct-output path.
    out = feed_forward_block(x, w1, w3, w2, tm=256, th=128)
    out = jax.block_until_ready(out)
    ref = reference(x, w1, w3, w2)
    assert out.shape == (B, S, D)
    assert jnp.allclose(out, ref, atol=2e-3, rtol=2e-3), "f32 mismatch vs reference"

    # Padding path: ragged token count and a d_model that is not lane-aligned.
    B2, S2, D2 = 2, 7, 32
    H2 = 4 * D2
    x2 = jax.random.normal(kx, (B2, S2, D2), dtype=jnp.float32)
    w1b = jax.random.normal(k1, (D2, H2), dtype=jnp.float32) * (1.0 / D2 ** 0.5)
    w3b = jax.random.normal(k3, (D2, H2), dtype=jnp.float32) * (1.0 / D2 ** 0.5)
    w2b = jax.random.normal(k2, (H2, D2), dtype=jnp.float32) * (1.0 / H2 ** 0.5)
    out2 = jax.block_until_ready(feed_forward_block(x2, w1b, w3b, w2b))
    assert jnp.allclose(out2, reference(x2, w1b, w3b, w2b), atol=2e-3, rtol=2e-3)

    # bf16 path (exercises the f32-scratch accumulator + MXU-native operands).
    xb = x.astype(jnp.bfloat16)
    w1c, w3c, w2c = (w.astype(jnp.bfloat16) for w in (w1, w3, w2))
    out3 = jax.block_until_ready(feed_forward_block(xb, w1c, w3c, w2c, th=256))
    ref3 = reference(xb.astype(jnp.float32), w1c.astype(jnp.float32),
                     w3c.astype(jnp.float32), w2c.astype(jnp.float32))
    assert out3.dtype == jnp.bfloat16
    assert jnp.allclose(out3.astype(jnp.float32), ref3, atol=0.1, rtol=0.05)

    # TODO(synk): dropout with p>0 would need pltpu.prng_seed/prng_random_bits; p=0.0 here so it is identity.
    print("KERNEL_OK")
</pallas_src>

<mosaic_0001>
module attributes {stable_mosaic.version = 11 : i64} {
  func.func @ffn_kernel_direct(%arg0: i32, %arg1: i32, %arg2: memref<128x128xf32, #tpu.memory_space<vmem>>, %arg3: memref<128x128xf32, #tpu.memory_space<vmem>>, %arg4: memref<128x128xf32, #tpu.memory_space<vmem>>, %arg5: memref<128x128xf32, #tpu.memory_space<vmem>>, %arg6: memref<128x128xf32, #tpu.memory_space<vmem>>) attributes {dimension_semantics = [#tpu.dimension_semantics<parallel>, #tpu.dimension_semantics<arbitrary>], iteration_bounds = array<i64: 1, 4>, scalar_prefetch = 0 : i64, scratch_operands = 0 : i64, tpu.core_type = #tpu.core_type<tc>, window_params = [{transform_indices = @transform_0, window_bounds = array<i64: 128, 128>}, {transform_indices = @transform_1, window_bounds = array<i64: 128, 128>}, {transform_indices = @transform_2, window_bounds = array<i64: 128, 128>}, {transform_indices = @transform_3, window_bounds = array<i64: 128, 128>}, {transform_indices = @transform_4, window_bounds = array<i64: 128, 128>}]} {
    %c0 = arith.constant 0 : index
    %c0_0 = arith.constant 0 : index
    %0 = vector.load %arg2[%c0, %c0_0] : memref<128x128xf32, #tpu.memory_space<vmem>>, vector<128x128xf32>
    %c0_1 = arith.constant 0 : index
    %c0_2 = arith.constant 0 : index
    %1 = vector.load %arg3[%c0_1, %c0_2] : memref<128x128xf32, #tpu.memory_space<vmem>>, vector<128x128xf32>
    %cst = arith.constant dense<0.000000e+00> : vector<128x128xf32>
    %2 = tpu.matmul %0, %1, %cst {dimension_numbers = #tpu.dot_dimension_numbers<[1], [0], [0], [1], [0, 0, 1, 1], [], []>} : vector<128x128xf32>, vector<128x128xf32>, vector<128x128xf32> -> vector<128x128xf32>
    %c0_3 = arith.constant 0 : index
    %c0_4 = arith.constant 0 : index
    %3 = vector.load %arg4[%c0_3, %c0_4] : memref<128x128xf32, #tpu.memory_space<vmem>>, vector<128x128xf32>
    %cst_5 = arith.constant dense<0.000000e+00> : vector<128x128xf32>
    %4 = tpu.matmul %0, %3, %cst_5 {dimension_numbers = #tpu.dot_dimension_numbers<[1], [0], [0], [1], [0, 0, 1, 1], [], []>} : vector<128x128xf32>, vector<128x128xf32>, vector<128x128xf32> -> vector<128x128xf32>
    %5 = arith.negf %2 : vector<128x128xf32>
    %6 = math.exp %5 : vector<128x128xf32>
    %cst_6 = arith.constant 1.000000e+00 : f32
    %7 = vector.broadcast %cst_6 : f32 to vector<128x128xf32>
    %8 = arith.addf %7, %6 : vector<128x128xf32>
    %9 = arith.divf %7, %8 : vector<128x128xf32>
    %10 = arith.mulf %2, %9 : vector<128x128xf32>
    %11 = arith.mulf %10, %4 : vector<128x128xf32>
    %c0_7 = arith.constant 0 : index
    %c0_8 = arith.constant 0 : index
    %12 = vector.load %arg5[%c0_7, %c0_8] : memref<128x128xf32, #tpu.memory_space<vmem>>, vector<128x128xf32>
    %cst_9 = arith.constant dense<0.000000e+00> : vector<128x128xf32>
    %13 = tpu.matmul %11, %12, %cst_9 {dimension_numbers = #tpu.dot_dimension_numbers<[1], [0], [0], [1], [0, 0, 1, 1], [], []>} : vector<128x128xf32>, vector<128x128xf32>, vector<128x128xf32> -> vector<128x128xf32>
    %c0_i32 = arith.constant 0 : i32
    %14 = arith.cmpi eq, %arg1, %c0_i32 : i32
    %15 = arith.extui %14 : i1 to i32
    %c0_i32_10 = arith.constant 0 : i32
    %16 = arith.cmpi ne, %15, %c0_i32_10 : i32
    scf.if %16 {
      %c0_13 = arith.constant 0 : index
      %c0_14 = arith.constant 0 : index
      %20 = vector.load %arg6[%c0_13, %c0_14] : memref<128x128xf32, #tpu.memory_space<vmem>>, vector<128x128xf32>
      tpu.vector_store %arg6[%c0_13, %c0_14], %13 {strides = array<i32>} : memref<128x128xf32, #tpu.memory_space<vmem>>, vector<128x128xf32>,
    } else {
    }
    %c0_i32_11 = arith.constant 0 : i32
    %17 = arith.cmpi ne, %arg1, %c0_i32_11 : i32
    %18 = arith.extui %17 : i1 to i32
    %c0_i32_12 = arith.constant 0 : i32
    %19 = arith.cmpi ne, %18, %c0_i32_12 : i32
    scf.if %19 {
      %c0_13 = arith.constant 0 : index
      %c0_14 = arith.constant 0 : index
      %20 = vector.load %arg6[%c0_13, %c0_14] : memref<128x128xf32, #tpu.memory_space<vmem>>, vector<128x128xf32>
      %21 = arith.addf %20, %13 : vector<128x128xf32>
      %c0_15 = arith.constant 0 : index
      %c0_16 = arith.constant 0 : index
      %22 = vector.load %arg6[%c0_15, %c0_16] : memref<128x128xf32, #tpu.memory_space<vmem>>, vector<128x128xf32>
      tpu.vector_store %arg6[%c0_15, %c0_16], %21 {strides = array<i32>} : memref<128x128xf32, #tpu.memory_space<vmem>>, vector<128x128xf32>,
    } else {
    }
    return
  }
  func.func @transform_0(%arg0: i32, %arg1: i32) -> (i32, i32) {
    %c0_i32 = arith.constant 0 : i32
    %c0_i32_0 = arith.constant 0 : i32
    return %arg0, %c0_i32 : i32, i32
  }
  func.func @transform_1(%arg0: i32, %arg1: i32) -> (i32, i32) {
    %c0_i32 = arith.constant 0 : i32
    %c0_i32_0 = arith.constant 0 : i32
    return %c0_i32, %arg1 : i32, i32
  }
  func.func @transform_2(%arg0: i32, %arg1: i32) -> (i32, i32) {
    %c0_i32 = arith.constant 0 : i32
    %c0_i32_0 = arith.constant 0 : i32
    return %c0_i32, %arg1 : i32, i32
  }
  func.func @transform_3(%arg0: i32, %arg1: i32) -> (i32, i32) {
    %c0_i32 = arith.constant 0 : i32
    %c0_i32_0 = arith.constant 0 : i32
    return %arg1, %c0_i32 : i32, i32
  }
  func.func @transform_4(%arg0: i32, %arg1: i32) -> (i32, i32) {
    %c0_i32 = arith.constant 0 : i32
    %c0_i32_0 = arith.constant 0 : i32
    return %arg0, %c0_i32 : i32, i32
  }
}

</mosaic_0001>

<bundles_post_ra>
// kernel: tpu_custom_call.1
= control target key start
LH: loop header
LB: loop body
LE: loop exit
PB: predicated region body
PF: predicated region fallthrough
CT: control target
= control target key end

     0   :  { %9 = vsyncpa [#allocation3], 0  ;;  %s2217_s0 = inlined_call_operand.hbm [shape: f32[128,128], index: 0, kind: input, shape index: {}]   ;;  %s2218_s1 = inlined_call_operand.hbm [shape: f32[128,512], index: 1, kind: input, shape index: {}]   ;;  %s2219_s2 = inlined_call_operand.hbm [shape: f32[128,512], index: 2, kind: input, shape index: {}]   ;;  %s2220_s3 = inlined_call_operand.hbm [shape: f32[512,128], index: 3, kind: input, shape index: {}]   ;;  %s2221_s4 = inlined_call_operand.hbm [shape: f32[128,128], index: 4, kind: output, shape index: {}]  }
   0x1   :  { %10 = vsyncpa [#allocation6], 0 }
   0x2   :  { %12 = vsyncpa [#allocation6 + $0x1], 0 }
   0x3   :  { %13 = vsyncpa [#allocation9], 0 }
   0x4   :  { %15 = vsyncpa [#allocation9 + $0x1], 0 }
   0x5   :  { %16 = vsyncpa [#allocation4], 0  ;;  %s1871_s15 = smov 0   ;;  %s1873_s16 = smov 0  }
   0x6   :  { %s1875_s17 = smov 0   ;;  %s1877_s18 = smov 0  }
   0x7   :  { %s1879_s19 = smov 0   ;;  %s1881_s20 = smov 0  }
   0x8 LB: > { %s31_s21 = sadd.s32 1, %s1830_s19  ;;  %s67_s22 = sadd.s32 1, %s1822_s17  ;;  %s1834_s20 = sphi %s1881_s20, %s22_s20   ;;  %s1830_s19 = sphi %s1879_s19, %s2231_s19   ;;  %s1826_s18 = sphi %s1877_s18, %s2230_s18   ;;  %s1822_s17 = sphi %s1875_s17, %s2229_s17   ;;  %s1818_s16 = sphi %s1873_s16, %s2228_s16   ;;  %s1814_s15 = sphi %s1871_s15, %s2227_s15  }
   0x9   : > { %p32_p0 = scmp.ge.s32.totalorder %s31_s21, 4  ;;  %p74_p1 = scmp.ne.s32.totalorder %s1822_s17, %s1818_s16 }
   0xa   : > { %p75_p2 = scmp.eq.s32.totalorder %s1834_s20, 0  ;;  %p1515_p5 = scmp.lt.s32.totalorder %s1834_s20, 4 }
   0xb   : > { %s2233_s21 = smov (%p32_p0, %s31_s21), 0  ;;  %s198_s25 = sand.u32 1, %s1834_s20  }
   0xc   : > { %p1908_p3 = por %p75_p2, %p74_p1  ;;  %s64_s24 = ssub.s32 %s1830_s19, %s2233_s21 }
   0xd   : > { %p65_p4 = scmp.eq.s32.totalorder %s64_s24, 0  ;;  %s200_s26 = sand.u32 1, %s1822_s17  }
   0xe   : > { %s1922_s28 = sshll.u32 %s200_s26, 7  ;;  %s1156_s29 = sshll.u32 %s1830_s19, 7 }
   0xf   : > { %s1918_s27 = scalar_select %p65_p4, %s1822_s17, %s67_s22  }
  0x10   : > { %s207_s6 = scalar_lea.hbm %s2218_s1, %s1156_s29  ;;  %s202_s7 = scalar_lea.vmem [#allocation5], %s1922_s28 }
  0x11   : > { %s208_s8 = sshll.u32 %s202_s7, 4  ;;  %p1931_p6 = pnand %p1515_p5, %p1908_p3  ;;  %s209_s8 = int_to_ptr.vmem [resolvable:$true] %s208_s8 }
  0x12   : > { %s1938_s12 = scalar_lea.hbm %s2219_s2, %s1156_s29  ;;  %s1940_s13 = scalar_lea.sflag [#allocation6], %s198_s25 }
  0x13   : > { %p1640_p7 = pneg %p1931_p6  ;;  %s1651_s14 = scalar_lea.vmem %s209_s8, 2048 }
  0x14   : > { %p1652_p8 = scmp.ne.s32.totalorder %s209_s8, %s1651_s14  ;;  %s1836_s22 = smov [#allocation5]  }
  0x15   : > { %s1656_s23 = sshll.u32 %s1836_s22, 4  ;;  %s1657_s23 = int_to_ptr.vmem [resolvable:$false] %s1656_s23 }
  0x16   : > { %p1654_p9 = pnand %p1652_p8, %p1640_p7  ;;  %s1658_s24 = scalar_lea.vmem %s1657_s23, 4096 }
  0x17   : > { %p1659_p11 = scmp.lt.s32.totalorder %s209_s8, %s1657_s23  ;;  %p1660_p12 = scmp.lt.s32.totalorder %s1658_s24, %s1651_s14 }
  0x18   : > { %p1655_p10 = pneg %p1654_p9 }
  0x19   : > { %p1661_p13 = por %p1660_p12, %p1659_p11 }
  0x1b   : > { %p1662_p0 = pnand %p1661_p13, %p1655_p10 }
  0x1d   : > { %1665 = shalt.err (!%p1662_p0)
}
  0x1e   : > { %s1837_s29 = smov 512   ;;  %s1838_s25 = smov 128  }
  0x1f   : > { %s1839_s30 = smov 8   ;;  %s1954_s5 = sadd.s32 4294967295, %s1834_s20  }
  0x20   : > { %1507 = dma.hbm_to_vmem [thread:$0]  (!%p1931_p6), %s207_s6, 2048, %s209_s8, %s1940_s13, %s1837_s29, %s1838_s25, %s1839_s30  }
  0x21   : > { %p80_p1 = scmp.ne.s32.totalorder %s1818_s16, %s1814_s15  ;;  %p81_p2 = scmp.eq.s32.totalorder %s1954_s5, 0 }
  0x22   : > { %p1152_p3 = scmp.ge.s32.totalorder %s1834_s20, 1  ;;  %p169_p4 = scmp.lt.s32.totalorder %s1834_s20, 5 }
  0x23   : > { %p1963_p5 = por %p81_p2, %p80_p1  ;;  %s1840_s6 = smov [#allocation2]  }
  0x24   : > { %p1967_p8 = pnand %p1152_p3, %p169_p4  ;;  %s184_s8 = sshll.u32 %s1840_s6, 4  ;;  %s1973_s8 = int_to_ptr.vmem [resolvable:$true] %s184_s8 }
  0x25   : > { %s222_s15 = scalar_lea.vmem [#allocation7], %s1922_s28  ;;  %s1841_s23 = smov [#allocation7]  }
  0x26   : > { %p1500_p9 = pneg %p1967_p8  ;;  %s228_s11 = sshll.u32 %s222_s15, 4  ;;  %s229_s11 = int_to_ptr.vmem [resolvable:$true] %s228_s11 }
  0x27   : > { %s1679_s22 = scalar_lea.vmem %s229_s11, 2048  ;;  %s1684_s24 = sshll.u32 %s1841_s23, 4  ;;  %s1685_s24 = int_to_ptr.vmem [resolvable:$false] %s1684_s24 }
  0x28   : > { %p1978_p10 = pnand %p1500_p9, %p81_p2  ;;  %p1680_p11 = scmp.ne.s32.totalorder %s229_s11, %s1679_s22 }
  0x29   : > { %s1686_s6 = scalar_lea.vmem %s1685_s24, 4096  ;;  %p1687_p0 = scmp.lt.s32.totalorder %s229_s11, %s1685_s24 }
  0x2a   : > { %p1682_p12 = pnand %p1680_p11, %p1640_p7  ;;  %p1688_p1 = scmp.lt.s32.totalorder %s1686_s6, %s1679_s22 }
  0x2c   : > { %p1683_p13 = pneg %p1682_p12  ;;  %p1689_p3 = por %p1688_p1, %p1687_p0 }
  0x2e   : > { %p1690_p4 = pnand %p1689_p3, %p1683_p13 }
  0x30   : > { %1693 = shalt.err (!%p1690_p4)
}
  0x31   : > { %1510 = dma.hbm_to_vmem [thread:$0]  (!%p1931_p6), %s1938_s12, 2048, %s229_s11, %s1940_s13, %s1837_s29, %s1838_s25, %s1839_s30  }
  0x32   : > { %p1696_p9 = pneg %p1978_p10  ;;  %s1705_s15 = scalar_lea.vmem %s1973_s8, 2048 }
  0x33   : > { %p1706_p11 = scmp.ne.s32.totalorder %s1973_s8, %s1705_s15  ;;  %p1713_p13 = scmp.lt.s32.totalorder %s1973_s8, %s1973_s8 }
  0x34   : > { %p1714_p1 = scmp.lt.s32.totalorder %s1705_s15, %s1705_s15 }
  0x35   : > { %p1708_p12 = pnand %p1706_p11, %p1696_p9 }
  0x36   : > { %p1715_p3 = por %p1714_p1, %p1713_p13 }
  0x37   : > { %p1709_p0 = pneg %p1708_p12 }
  0x39   : > { %p1716_p4 = pnand %p1715_p3, %p1709_p0 }
  0x3b   : > { %1719 = shalt.err (!%p1716_p4)
}
  0x3c   : > { %1503 = dma.hbm_to_vmem [thread:$0]  (!%p1978_p10), %s2217_s0, 2048, %s1973_s8, [#allocation3], %s1838_s25, %s1838_s25, %s1839_s30  }
  0x3d   : > { %s1189_s13 = sshll.u32 %s1830_s19, 11  ;;  %s242_s29 = scalar_lea.vmem [#allocation8], %s1922_s28 }
  0x3e   : > { %s249_s11 = sshll.u32 %s242_s29, 4  ;;  %s248_s6 = scalar_lea.hbm %s2220_s3, %s1189_s13  ;;  %s250_s11 = int_to_ptr.vmem [resolvable:$true] %s249_s11 }
  0x3f   : > { %s239_s14 = scalar_lea.sflag [#allocation9], %s200_s26  ;;  %s1733_s15 = scalar_lea.vmem %s250_s11, 2048 }
  0x40   : > { %p1734_p9 = scmp.ne.s32.totalorder %s250_s11, %s1733_s15  ;;  %s1842_s22 = smov [#allocation8]  }
  0x41   : > { %s1738_s12 = sshll.u32 %s1842_s22, 4  ;;  %s1739_s12 = int_to_ptr.vmem [resolvable:$false] %s1738_s12 }
  0x42   : > { %p1736_p11 = pnand %p1734_p9, %p1640_p7  ;;  %s1740_s8 = scalar_lea.vmem %s1739_s12, 4096 }
  0x43   : > { %p1741_p10 = scmp.lt.s32.totalorder %s250_s11, %s1739_s12  ;;  %p1742_p0 = scmp.lt.s32.totalorder %s1740_s8, %s1733_s15 }
  0x44   : > { %p1737_p12 = pneg %p1736_p11 }
  0x45   : > { %p1743_p13 = por %p1742_p0, %p1741_p10 }
  0x47   : > { %p1744_p1 = pnand %p1743_p13, %p1737_p12 }
  0x49   : > { %1747 = shalt.err (!%p1744_p1)
}
  0x4a   : > { %1513 = dma.hbm_to_vmem [thread:$0]  (!%p1931_p6), %s248_s6, 2048, %s250_s11, %s239_s14, %s1838_s25, %s1838_s25, %s1839_s30  }
  0x4b   : > { %261 = sbr.rel (%p1967_p8) target bundleno = 619 (0x26b), region = 36 }
  0x50   : > { %1797 = dma.done.wait (%p81_p2), [#allocation3], 2048  }
  0x51   : > { %1799 = vsyncadd (%p81_p2), [#allocation3], 4294965248  ;;  %s267_s26 = sand.u32 1, %s1954_s5   ;;  %s269_s28 = sand.u32 1, %s1818_s16  }
  0x52   : > { %s1164_s13 = sshll.u32 %s269_s28, 7  ;;  %s268_s9 = scalar_lea.sflag [#allocation6], %s267_s26 }
  0x53   : > { %s2030_s29 = scalar_lea.vmem [#allocation5], %s1164_s13 }
  0x54   : > { %1801 = dma.done.wait (%p1963_p5), %s268_s9, 4096  }
  0x55   : > { %1803 = vsyncadd (%p1963_p5), %s268_s9, 4294963200  ;;  %s2036_s25 = scalar_lea.vmem [#allocation7], %s1164_s13  ;;  %s286_s30 = scalar_lea.sflag [#allocation9], %s269_s28 }
  0x56   : > { %s2038_s10 = scalar_lea.vmem [#allocation8], %s1164_s13 }
  0x57   : > { %1805 = dma.done.wait (%p1963_p5), %s286_s30, 2048  }
  0x58   : > { %1807 = vsyncadd (%p1963_p5), %s286_s30, 4294965248  ;;  %v353_v0 = vld [vmem:[%s2030_s29 + $0x78] sm:$0xff]  ;;  %v352_v1 = vld [vmem:[%s2030_s29 + $0x70] sm:$0xff]  ;;  %p1183_p6 = scmp.ne.s32.totalorder %s1826_s18, 0 }
  0x59   : > { %1286 = vmatprep.subr.mxu0 %v353_v0  ;;  %v351_v2 = vld [vmem:[%s2030_s29 + $0x68] sm:$0xff]  ;;  %v350_v3 = vld [vmem:[%s2030_s29 + $0x60] sm:$0xff]  ;;  %v349_v5 = vld [vmem:[%s2030_s29 + $0x58] sm:$0xff] }
  0x5a   : > { %1287 = vmatpush3.msra.mxu0 %v353_v0  ;;  %v2048_v4 = vld [vmem:[#allocation2] sm:$0xff]  ;;  %v514_v6 = vld [vmem:[%s2036_s25 + $0x78] sm:$0xff]  ;;  %v513_v7 = vld [vmem:[%s2036_s25 + $0x70] sm:$0xff] }
  0x5b   : > { %1288 = vmatprep.subr.mxu0 %v352_v1  ;;  %1318 = vmatprep.mubr.f32.mxu0 %v2048_v4  ;;  %v348_v8 = vld [vmem:[%s2030_s29 + $0x50] sm:$0xff]  ;;  %v512_v9 = vld [vmem:[%s2036_s25 + $0x68] sm:$0xff]  ;;  %v511_v11 = vld [vmem:[%s2036_s25 + $0x60] sm:$0xff] }
  0x5c   : > { %1289 = vmatpush3.msra.mxu0 %v352_v1  ;;  %1342 = vmatprep.subr.mxu1 %v514_v6  ;;  %v347_v10 = vld [vmem:[%s2030_s29 + $0x48] sm:$0xff]  ;;  %v346_v12 = vld [vmem:[%s2030_s29 + $0x40] sm:$0xff]  ;;  %v510_v13 = vld [vmem:[%s2036_s25 + $0x58] sm:$0xff] }
  0x5d   : > { %1290 = vmatprep.subr.mxu0 %v351_v2  ;;  %1343 = vmatpush3.msra.mxu1 %v514_v6  ;;  %v345_v14 = vld [vmem:[%s2030_s29 + $0x38] sm:$0xff]  ;;  %v509_v15 = vld [vmem:[%s2036_s25 + $0x50] sm:$0xff]  ;;  %v508_v17 = vld [vmem:[%s2036_s25 + $0x48] sm:$0xff] }
  0x5e   : > { %1291 = vmatpush3.msra.mxu0 %v351_v2  ;;  %1344 = vmatprep.subr.mxu1 %v513_v7  ;;  %v344_v16 = vld [vmem:[%s2030_s29 + $0x30] sm:$0xff]  ;;  %v343_v18 = vld [vmem:[%s2030_s29 + $0x28] sm:$0xff]  ;;  %v507_v19 = vld [vmem:[%s2036_s25 + $0x40] sm:$0xff] }
  0x5f   : > { %1292 = vmatprep.subr.mxu0 %v350_v3  ;;  %1345 = vmatpush3.msra.mxu1 %v513_v7  ;;  %v342_v20 = vld [vmem:[%s2030_s29 + $0x20] sm:$0xff]  ;;  %v506_v21 = vld [vmem:[%s2036_s25 + $0x38] sm:$0xff]  ;;  %v505_v23 = vld [vmem:[%s2036_s25 + $0x30] sm:$0xff] }
  0x60   : > { %1293 = vmatpush3.msra.mxu0 %v350_v3  ;;  %1346 = vmatprep.subr.mxu1 %v512_v9  ;;  %v341_v22 = vld [vmem:[%s2030_s29 + $0x18] sm:$0xff]  ;;  %v340_v24 = vld [vmem:[%s2030_s29 + $0x10] sm:$0xff]  ;;  %v504_v25 = vld [vmem:[%s2036_s25 + $0x28] sm:$0xff] }
  0x61   : > { %1294 = vmatprep.subr.mxu0 %v349_v5  ;;  %1347 = vmatpush3.msra.mxu1 %v512_v9  ;;  %v339_v26 = vld [vmem:[%s2030_s29 + $0x8] sm:$0xff]  ;;  %v503_v27 = vld [vmem:[%s2036_s25 + $0x20] sm:$0xff]  ;;  %v502_v29 = vld [vmem:[%s2036_s25 + $0x18] sm:$0xff] }
  0x62   : > { %1295 = vmatpush3.msra.mxu0 %v349_v5  ;;  %1348 = vmatprep.subr.mxu1 %v511_v11  ;;  %v338_v28 = vld [vmem:[%s2030_s29] sm:$0xff]  ;;  %v323_v30 = vld [vmem:[#allocation2 + $0x8] sm:$0xff]  ;;  %v501_v31 = vld [vmem:[%s2036_s25 + $0x10] sm:$0xff] }
  0x63   : > { %1296 = vmatprep.subr.mxu0 %v348_v8  ;;  %1349 = vmatpush3.msra.mxu1 %v511_v11  ;;  %v324_v32 = vld [vmem:[#allocation2 + $0x10] sm:$0xff]  ;;  %v500_v33 = vld [vmem:[%s2036_s25 + $0x8] sm:$0xff]  ;;  %v325_v34 = vld [vmem:[#allocation2 + $0x18] sm:$0xff] }
  0x64   : > { %1297 = vmatpush3.msra.mxu0 %v348_v8  ;;  %1350 = vmatprep.subr.mxu1 %v510_v13  ;;  %v499_v35 = vld [vmem:[%s2036_s25] sm:$0xff]  ;;  %v327_v37 = vld [vmem:[#allocation2 + $0x28] sm:$0xff]  ;;  %v328_v38 = vld [vmem:[#allocation2 + $0x30] sm:$0xff] }
  0x65   : > { %1298 = vmatprep.subr.mxu0 %v347_v10  ;;  %1351 = vmatpush3.msra.mxu1 %v510_v13  ;;  %v326_v36 = vld [vmem:[#allocation2 + $0x20] sm:$0xff]  ;;  %v329_v39 = vld [vmem:[#allocation2 + $0x38] sm:$0xff]  ;;  %v331_v41 = vld [vmem:[#allocation2 + $0x48] sm:$0xff] }
  0x66   : > { %1299 = vmatpush3.msra.mxu0 %v347_v10  ;;  %1352 = vmatprep.subr.mxu1 %v509_v15  ;;  %v330_v40 = vld [vmem:[#allocation2 + $0x40] sm:$0xff]  ;;  %v332_v42 = vld [vmem:[#allocation2 + $0x50] sm:$0xff]  ;;  %v333_v43 = vld [vmem:[#allocation2 + $0x58] sm:$0xff] }
  0x67   : > { %1300 = vmatprep.subr.mxu0 %v346_v12  ;;  %1353 = vmatpush3.msra.mxu1 %v509_v15  ;;  %v334_v44 = vld [vmem:[#allocation2 + $0x60] sm:$0xff]  ;;  %v335_v45 = vld [vmem:[#allocation2 + $0x68] sm:$0xff]  ;;  %v336_v46 = vld [vmem:[#allocation2 + $0x70] sm:$0xff] }
  0x68   : > { %1301 = vmatpush3.msra.mxu0 %v346_v12  ;;  %1354 = vmatprep.subr.mxu1 %v508_v17  ;;  %v337_v47 = vld [vmem:[#allocation2 + $0x78] sm:$0xff]  ;;  %v802_v49 = vld [vmem:[%s2038_s10 + $0x70] sm:$0xff]  ;;  %v801_v50 = vld [vmem:[%s2038_s10 + $0x68] sm:$0xff] }
  0x69   : > { %1302 = vmatprep.subr.mxu0 %v345_v14  ;;  %1355 = vmatpush3.msra.mxu1 %v508_v17  ;;  %v803_v48 = vld [vmem:[%s2038_s10 + $0x78] sm:$0xff]  ;;  %v800_v51 = vld [vmem:[%s2038_s10 + $0x60] sm:$0xff]  ;;  %v798_v53 = vld [vmem:[%s2038_s10 + $0x50] sm:$0xff] }
  0x6a   : > { %1303 = vmatpush3.msra.mxu0 %v345_v14  ;;  %1356 = vmatprep.subr.mxu1 %v507_v19  ;;  %v799_v52 = vld [vmem:[%s2038_s10 + $0x58] sm:$0xff]  ;;  %v797_v54 = vld [vmem:[%s2038_s10 + $0x48] sm:$0xff]  ;;  %v796_v55 = vld [vmem:[%s2038_s10 + $0x40] sm:$0xff] }
  0x6b   : > { %1304 = vmatprep.subr.mxu0 %v344_v16  ;;  %1357 = vmatpush3.msra.mxu1 %v507_v19  ;;  %v795_v56 = vld [vmem:[%s2038_s10 + $0x38] sm:$0xff]  ;;  %v794_v57 = vld [vmem:[%s2038_s10 + $0x30] sm:$0xff]  ;;  %v793_v58 = vld [vmem:[%s2038_s10 + $0x28] sm:$0xff] }
  0x6c   : > { %1305 = vmatpush3.msra.mxu0 %v344_v16  ;;  %1358 = vmatprep.subr.mxu1 %v506_v21  ;;  %v792_v59 = vld [vmem:[%s2038_s10 + $0x20] sm:$0xff]  ;;  %v791_v60 = vld [vmem:[%s2038_s10 + $0x18] sm:$0xff]  ;;  %v790_v61 = vld [vmem:[%s2038_s10 + $0x10] sm:$0xff] }
  0x6d   : > { %1306 = vmatprep.subr.mxu0 %v343_v18  ;;  %1359 = vmatpush3.msra.mxu1 %v506_v21  ;;  %v789_v62 = vld [vmem:[%s2038_s10 + $0x8] sm:$0xff]  ;;  %v788_v63 = vld [vmem:[%s2038_s10] sm:$0xff] }
  0x6e   : > { %1307 = vmatpush3.msra.mxu0 %v343_v18  ;;  %1360 = vmatprep.subr.mxu1 %v505_v23 }
  0x6f   : > { %1308 = vmatprep.subr.mxu0 %v342_v20  ;;  %1361 = vmatpush3.msra.mxu1 %v505_v23 }
  0x70   : > { %1309 = vmatpush3.msra.mxu0 %v342_v20  ;;  %1362 = vmatprep.subr.mxu1 %v504_v25 }
  0x71   : > { %1310 = vmatprep.subr.mxu0 %v341_v22  ;;  %1363 = vmatpush3.msra.mxu1 %v504_v25 }
  0x72   : > { %1311 = vmatpush3.msra.mxu0 %v341_v22  ;;  %1364 = vmatprep.subr.mxu1 %v503_v27 }
  0x73   : > { %1312 = vmatprep.subr.mxu0 %v340_v24  ;;  %1365 = vmatpush3.msra.mxu1 %v503_v27 }
  0x74   : > { %1313 = vmatpush3.msra.mxu0 %v340_v24  ;;  %1366 = vmatprep.subr.mxu1 %v502_v29 }
  0x75   : > { %1314 = vmatprep.subr.mxu0 %v339_v26  ;;  %1367 = vmatpush3.msra.mxu1 %v502_v29 }
  0x76   : > { %1315 = vmatpush3.msra.mxu0 %v339_v26  ;;  %1368 = vmatprep.subr.mxu1 %v501_v31 }
  0x77   : > { %1316 = vmatprep.subr.mxu0 %v338_v28  ;;  %1369 = vmatpush3.msra.mxu1 %v501_v31 }
  0x78   : > { %1317 = vmatpush3.msra.mxu0 %v338_v28  ;;  %1370 = vmatprep.subr.mxu1 %v500_v33 }
  0x79   : > { %1319 = vmatmul.mubr.f32.vlgmr.msra.gmra.mxu0 %v323_v30  ;;  %1374 = vmatprep.mubr.f32.mxu1 %v2048_v4 }
  0x7a   : > { %1321 = vmatprep.mubr.f32.mxu0 %v324_v32  ;;  %1371 = vmatpush3.msra.mxu1 %v500_v33 }
  0x7b   : > { %1372 = vmatprep.subr.mxu1 %v499_v35  ;;  %1398 = vmatprep.subr.mxu0 %v803_v48 }
  0x7c   : > { %1373 = vmatpush3.msra.mxu1 %v499_v35  ;;  %1399 = vmatpush3.msra.mxu0 %v803_v48 }
  0x7d   : > { %1322 = vmatmul.mubr.f32.gmra.mxu0 %v325_v34  ;;  %1375 = vmatmul.mubr.f32.vlgmr.msra.gmra.mxu1 %v323_v30 }
  0x7e   : > { %1324 = vmatprep.mubr.f32.mxu0 %v326_v36  ;;  %1377 = vmatprep.mubr.f32.mxu1 %v324_v32 }
  0x7f   : > { %1454 = vmatprep.subr.mxu1 %v803_v48  ;;  %1400 = vmatprep.subr.mxu0 %v802_v49 }
  0x80   : > { %1470 = vmatpush3.msra.mxu1 %v803_v48  ;;  %1401 = vmatpush3.msra.mxu0 %v802_v49 }
  0x81   : > { %1325 = vmatmul.mubr.f32.gmra.mxu0 %v327_v37  ;;  %1378 = vmatmul.mubr.f32.gmra.mxu1 %v325_v34 }
  0x82   : > { %1327 = vmatprep.mubr.f32.mxu0 %v328_v38  ;;  %1380 = vmatprep.mubr.f32.mxu1 %v326_v36 }
  0x83   : > { %1455 = vmatprep.subr.mxu1 %v802_v49  ;;  %1402 = vmatprep.subr.mxu0 %v801_v50 }
  0x84   : > { %1471 = vmatpush3.msra.mxu1 %v802_v49  ;;  %1403 = vmatpush3.msra.mxu0 %v801_v50 }
  0x85   : > { %1328 = vmatmul.mubr.f32.gmra.mxu0 %v329_v39  ;;  %1381 = vmatmul.mubr.f32.gmra.mxu1 %v327_v37 }
  0x86   : > { %1330 = vmatprep.mubr.f32.mxu0 %v330_v40  ;;  %1383 = vmatprep.mubr.f32.mxu1 %v328_v38 }
  0x87   : > { %1456 = vmatprep.subr.mxu1 %v801_v50  ;;  %1404 = vmatprep.subr.mxu0 %v800_v51 }
  0x88   : > { %1472 = vmatpush3.msra.mxu1 %v801_v50  ;;  %1405 = vmatpush3.msra.mxu0 %v800_v51 }
  0x89   : > { %1331 = vmatmul.mubr.f32.gmra.mxu0 %v331_v41  ;;  %1384 = vmatmul.mubr.f32.gmra.mxu1 %v329_v39 }
  0x8a   : > { %1333 = vmatprep.mubr.f32.mxu0 %v332_v42  ;;  %1386 = vmatprep.mubr.f32.mxu1 %v330_v40 }
  0x8b   : > { %1457 = vmatprep.subr.mxu1 %v800_v51  ;;  %1406 = vmatprep.subr.mxu0 %v799_v52 }
  0x8c   : > { %1473 = vmatpush3.msra.mxu1 %v800_v51  ;;  %1407 = vmatpush3.msra.mxu0 %v799_v52 }
  0x8d   : > { %1334 = vmatmul.mubr.f32.gmra.mxu0 %v333_v43  ;;  %1387 = vmatmul.mubr.f32.gmra.mxu1 %v331_v41 }
  0x8e   : > { %1336 = vmatprep.mubr.f32.mxu0 %v334_v44  ;;  %1389 = vmatprep.mubr.f32.mxu1 %v332_v42 }
  0x8f   : > { %1458 = vmatprep.subr.mxu1 %v799_v52  ;;  %1408 = vmatprep.subr.mxu0 %v798_v53 }
  0x90   : > { %1474 = vmatpush3.msra.mxu1 %v799_v52  ;;  %1409 = vmatpush3.msra.mxu0 %v798_v53 }
  0x91   : > { %1337 = vmatmul.mubr.f32.gmra.mxu0 %v335_v45  ;;  %1390 = vmatmul.mubr.f32.gmra.mxu1 %v333_v43 }
  0x92   : > { %1339 = vmatprep.mubr.f32.mxu0 %v336_v46  ;;  %1392 = vmatprep.mubr.f32.mxu1 %v334_v44 }
  0x93   : > { %1459 = vmatprep.subr.mxu1 %v798_v53  ;;  %1410 = vmatprep.subr.mxu0 %v797_v54 }
  0x94   : > { %1475 = vmatpush3.msra.mxu1 %v798_v53  ;;  %1411 = vmatpush3.msra.mxu0 %v797_v54 }
  0x95   : > { %1340 = vmatmul.mubr.f32.gmra.mxu0 %v337_v47  ;;  %1393 = vmatmul.mubr.f32.gmra.mxu1 %v335_v45 }
  0x96   : > { %1395 = vmatprep.mubr.f32.mxu1 %v336_v46  ;;  %1460 = vmatprep.subr.mxu1 %v797_v54 }
  0x97   : > { %1476 = vmatpush3.msra.mxu1 %v797_v54  ;;  %1412 = vmatprep.subr.mxu0 %v796_v55 }
  0x98   : > { %1461 = vmatprep.subr.mxu1 %v796_v55  ;;  %1413 = vmatpush3.msra.mxu0 %v796_v55 }
  0x99   : > { %1396 = vmatmul.mubr.f32.gmra.mxu1 %v337_v47  ;;  %1414 = vmatprep.subr.mxu0 %v795_v56 }
  0x9a   : > { %1477 = vmatpush3.msra.mxu1 %v796_v55  ;;  %1415 = vmatpush3.msra.mxu0 %v795_v56 }
  0x9b   : > { %1462 = vmatprep.subr.mxu1 %v795_v56  ;;  %1416 = vmatprep.subr.mxu0 %v794_v57 }
  0x9c   : > { %1478 = vmatpush3.msra.mxu1 %v795_v56  ;;  %1417 = vmatpush3.msra.mxu0 %v794_v57 }
  0x9d   : > { %1463 = vmatprep.subr.mxu1 %v794_v57  ;;  %1418 = vmatprep.subr.mxu0 %v793_v58 }
  0x9e   : > { %1479 = vmatpush3.msra.mxu1 %v794_v57  ;;  %1419 = vmatpush3.msra.mxu0 %v793_v58 }
  0x9f   : > { %1464 = vmatprep.subr.mxu1 %v793_v58  ;;  %1420 = vmatprep.subr.mxu0 %v792_v59 }
  0xa0   : > { %1480 = vmatpush3.msra.mxu1 %v793_v58  ;;  %1421 = vmatpush3.msra.mxu0 %v792_v59 }
  0xa1   : > { %1465 = vmatprep.subr.mxu1 %v792_v59  ;;  %1422 = vmatprep.subr.mxu0 %v791_v60 }
  0xa2   : > { %1481 = vmatpush3.msra.mxu1 %v792_v59  ;;  %1423 = vmatpush3.msra.mxu0 %v791_v60 }
  0xa3   : > { %1466 = vmatprep.subr.mxu1 %v791_v60  ;;  %1424 = vmatprep.subr.mxu0 %v790_v61 }
  0xa4   : > { %1482 = vmatpush3.msra.mxu1 %v791_v60  ;;  %1425 = vmatpush3.msra.mxu0 %v790_v61 }
  0xa5   : > { %1467 = vmatprep.subr.mxu1 %v790_v61  ;;  %1426 = vmatprep.subr.mxu0 %v789_v62 }
  0xa6   : > { %1483 = vmatpush3.msra.mxu1 %v790_v61  ;;  %1427 = vmatpush3.msra.mxu0 %v789_v62 }
  0xa7   : > { %1468 = vmatprep.subr.mxu1 %v789_v62  ;;  %1428 = vmatprep.subr.mxu0 %v788_v63 }
  0xa8   : > { %1484 = vmatpush3.msra.mxu1 %v789_v62  ;;  %1429 = vmatpush3.msra.mxu0 %v788_v63 }
  0xa9   : > { %1469 = vmatprep.subr.mxu1 %v788_v63 }
  0xaa   : > { %1485 = vmatpush3.msra.mxu1 %v788_v63 }
 0x139   : > { %v2096_v0 = vpop.f32.mrf.mxu0 }
 0x13a   : > { %v1168_v1 = vmul.f32 -1.442695, %v2096_v0 }
 0x13b   : > { %v2099_v2 = vpop.f32.mrf.mxu0 }
 0x13c   : > { %1574 = vpow2.f32 %v1168_v1  ;;  %v1167_v3 = vmul.f32 -1.442695, %v2099_v2 }
 0x13d   : > { %v2102_v4 = vpop.f32.mrf.mxu0  ;;  %v2107_v7 = vpop.f32.mrf.mxu1 }
 0x13e   : > { %1576 = vpow2.f32 %v1167_v3  ;;  %v1170_v5 = vmul.f32 -1.442695, %v2102_v4 }
 0x13f   : > { %v2105_v6 = vpop.f32.mrf.mxu0  ;;  %v2113_v11 = vpop.f32.mrf.mxu1 }
 0x140   : > { %1578 = vpow2.f32 %v1170_v5  ;;  %v1169_v8 = vmul.f32 -1.442695, %v2105_v6 }
 0x141   : > { %v2110_v9 = vpop.f32.mrf.mxu0  ;;  %v2121_v16 = vpop.f32.mrf.mxu1 }
 0x142   : > { %1580 = vpow2.f32 %v1169_v8  ;;  %v1172_v10 = vmul.f32 -1.442695, %v2110_v9 }
 0x143   : > { %v2115_v12 = vpop.f32.mrf.mxu0  ;;  %v2129_v23 = vpop.f32.mrf.mxu1 }
 0x144   : > { %1582 = vpow2.f32 %v1172_v10  ;;  %v1171_v13 = vmul.f32 -1.442695, %v2115_v12 }
 0x145   : > { %v2118_v14 = vpop.f32.mrf.mxu0  ;;  %v2137_v32 = vpop.f32.mrf.mxu1 }
 0x146   : > { %1584 = vpow2.f32 %v1171_v13  ;;  %v1174_v15 = vmul.f32 -1.442695, %v2118_v14 }
 0x147   : > { %v2123_v17 = vpop.f32.mrf.mxu0  ;;  %v2145_v41 = vpop.f32.mrf.mxu1 }
 0x148   : > { %1586 = vpow2.f32 %v1174_v15  ;;  %v1173_v18 = vmul.f32 -1.442695, %v2123_v17 }
 0x149   : > { %v1575_v19 = vpop.eup %1574  ;;  %v2126_v20 = vpop.f32.mrf.mxu0 }
 0x14a   : > { %v709_v21 = vadd.f32 1.0, %v1575_v19  ;;  %1588 = vpow2.f32 %v1173_v18  ;;  %v1176_v22 = vmul.f32 -1.442695, %v2126_v20  ;;  %v2153_v50 = vpop.f32.mrf.mxu1 }
 0x14b   : > { %v1577_v24 = vpop.eup %1576  ;;  %v2131_v25 = vpop.f32.mrf.mxu0 }
 0x14c   : > { %1590 = vrcp.f32 %v709_v21  ;;  %v708_v26 = vadd.f32 1.0, %v1577_v24  ;;  %v1175_v27 = vmul.f32 -1.442695, %v2131_v25  ;;  %v611_v57 = vpop.f32.mrf.mxu1 }
 0x14d   : > { %v1579_v28 = vpop.eup %1578  ;;  %1592 = vpow2.f32 %v1176_v22  ;;  %v2134_v29 = vpop.f32.mrf.mxu0 }
 0x14e   : > { %1594 = vrcp.f32 %v708_v26  ;;  %v711_v30 = vadd.f32 1.0, %v1579_v28  ;;  %v1178_v31 = vmul.f32 -1.442695, %v2134_v29  ;;  %v1388_v8 = vpop.f32.mrf.mxu1 }
 0x14f   : > { %v1581_v33 = vpop.eup %1580  ;;  %1596 = vpow2.f32 %v1175_v27  ;;  %v2139_v34 = vpop.f32.mrf.mxu0 }
 0x150   : > { %1598 = vrcp.f32 %v711_v30  ;;  %v710_v35 = vadd.f32 1.0, %v1581_v33  ;;  %v1177_v36 = vmul.f32 -1.442695, %v2139_v34 }
 0x151   : > { %v1583_v37 = vpop.eup %1582  ;;  %1600 = vpow2.f32 %v1178_v31  ;;  %v2142_v38 = vpop.f32.mrf.mxu0 }
 0x152   : > { %1602 = vrcp.f32 %v710_v35  ;;  %v713_v39 = vadd.f32 1.0, %v1583_v37  ;;  %v1180_v40 = vmul.f32 -1.442695, %v2142_v38 }
 0x153   : > { %v1585_v42 = vpop.eup %1584  ;;  %1604 = vpow2.f32 %v1177_v36  ;;  %v2147_v43 = vpop.f32.mrf.mxu0 }
 0x154   : > { %1606 = vrcp.f32 %v713_v39  ;;  %v712_v44 = vadd.f32 1.0, %v1585_v42  ;;  %v1179_v45 = vmul.f32 -1.442695, %v2147_v43 }
 0x155   : > { %v1587_v46 = vpop.eup %1586  ;;  %1608 = vpow2.f32 %v1180_v40  ;;  %v2150_v47 = vpop.f32.mrf.mxu0 }
 0x156   : > { %1610 = vrcp.f32 %v712_v44  ;;  %v715_v48 = vadd.f32 1.0, %v1587_v46  ;;  %v1182_v49 = vmul.f32 -1.442695, %v2150_v47 }
 0x157   : > { %v1589_v51 = vpop.eup %1588  ;;  %1612 = vpow2.f32 %v1179_v45  ;;  %v2155_v52 = vpop.f32.mrf.mxu0 }
 0x158   : > { %1614 = vrcp.f32 %v715_v48  ;;  %v714_v53 = vadd.f32 1.0, %v1589_v51  ;;  %v1181_v54 = vmul.f32 -1.442695, %v2155_v52 }
 0x159   : > { %v1591_v55 = vpop.eup %1590  ;;  %1616 = vpow2.f32 %v1182_v49 }
 0x15a   : > { %v1593_v56 = vpop.eup %1592  ;;  %1618 = vrcp.f32 %v714_v53  ;;  %v757_v59 = vmul.f32 %v1591_v55, %v2096_v0 }
 0x15b   : > { %v1595_v58 = vpop.eup %1594  ;;  %v717_v60 = vadd.f32 1.0, %v1593_v56  ;;  %1620 = vpow2.f32 %v1181_v54 }
 0x15c   : > { %v1597_v61 = vpop.eup %1596  ;;  %v756_v62 = vmul.f32 %v1595_v58, %v2099_v2  ;;  %v773_v18 = vmul.f32 %v2107_v7, %v757_v59 }
 0x15d   : > { %v1599_v63 = vpop.eup %1598  ;;  %1622 = vrcp.f32 %v717_v60  ;;  %v716_v1 = vadd.f32 1.0, %v1597_v61 }
 0x15e   : > { %v1601_v3 = vpop.eup %1600  ;;  %v772_v5 = vmul.f32 %v756_v62, %v2113_v11  ;;  %v759_v13 = vmul.f32 %v1599_v63, %v2102_v4  ;;  %v621_v11 = vpop.f32.mrf.mxu1 }
 0x15f   : > { %v1603_v10 = vpop.eup %1602  ;;  %1624 = vrcp.f32 %v716_v1  ;;  %v719_v15 = vadd.f32 1.0, %v1601_v3 }
 0x160   : > { %v1605_v0 = vpop.eup %1604  ;;  %v758_v19 = vmul.f32 %v1603_v10, %v2105_v6  ;;  %1430 = vmatprep.mubr.f32.mxu0 %v772_v5  ;;  %v775_v28 = vmul.f32 %v2121_v16, %v759_v13 }
 0x161   : > { %v1607_v21 = vpop.eup %1606  ;;  %1626 = vrcp.f32 %v719_v15  ;;  %v718_v2 = vadd.f32 1.0, %v1605_v0  ;;  %1431 = vmatmul.mubr.f32.vlgmr.msra.gmra.mxu0 %v773_v18 }
 0x162   : > { %v1609_v22 = vpop.eup %1608  ;;  %v774_v24 = vmul.f32 %v758_v19, %v2129_v23  ;;  %v761_v27 = vmul.f32 %v1607_v21, %v2110_v9  ;;  %v1391_v23 = vpop.f32.mrf.mxu1 }
 0x163   : > { %v1611_v26 = vpop.eup %1610  ;;  %1628 = vrcp.f32 %v718_v2  ;;  %v721_v4 = vadd.f32 1.0, %v1609_v22 }
 0x164   : > { %v1613_v7 = vpop.eup %1612  ;;  %v760_v30 = vmul.f32 %v1611_v26, %v2115_v12  ;;  %1433 = vmatprep.mubr.f32.mxu0 %v774_v24  ;;  %v777_v39 = vmul.f32 %v2137_v32, %v761_v27  ;;  %v631_v45 = vpop.f32.mrf.mxu1 }
 0x165   : > { %v1615_v6 = vpop.eup %1614  ;;  %1630 = vrcp.f32 %v721_v4  ;;  %v720_v31 = vadd.f32 1.0, %v1613_v7  ;;  %1434 = vmatmul.mubr.f32.gmra.mxu0 %v775_v28 }
 0x166   : > { %v1617_v33 = vpop.eup %1616  ;;  %v776_v35 = vmul.f32 %v760_v30, %v2145_v41  ;;  %v763_v37 = vmul.f32 %v1615_v6, %v2118_v14  ;;  %v1394_v49 = vpop.f32.mrf.mxu1 }
 0x167   : > { %v1619_v36 = vpop.eup %1618  ;;  %1632 = vrcp.f32 %v720_v31  ;;  %v723_v9 = vadd.f32 1.0, %v1617_v33 }
 0x168   : > { %v1621_v16 = vpop.eup %1620  ;;  %v762_v40 = vmul.f32 %v1619_v36, %v2123_v17  ;;  %1436 = vmatprep.mubr.f32.mxu0 %v776_v35  ;;  %v779_v41 = vmul.f32 %v2153_v50, %v763_v37  ;;  %v641_v50 = vpop.f32.mrf.mxu1 }
 0x169   : > { %1634 = vrcp.f32 %v723_v9  ;;  %v722_v12 = vadd.f32 1.0, %v1621_v16  ;;  %1437 = vmatmul.mubr.f32.gmra.mxu0 %v777_v39 }
 0x16a   : > { %v1623_v42 = vpop.eup %1622  ;;  %v778_v44 = vmul.f32 %v762_v40, %v611_v57  ;;  %v1397_v61 = vpop.f32.mrf.mxu1 }
 0x16b   : > { %1636 = vrcp.f32 %v722_v12  ;;  %v765_v14 = vmul.f32 %v1623_v42, %v2126_v20 }
 0x16c   : > { %v1625_v46 = vpop.eup %1624  ;;  %1439 = vmatprep.mubr.f32.mxu0 %v778_v44  ;;  %v651_v3 = vpop.f32.mrf.mxu1 }
 0x16d   : > { %v764_v48 = vmul.f32 %v1625_v46, %v2131_v25  ;;  %1440 = vmatmul.mubr.f32.gmra.mxu0 %v779_v41  ;;  %v781_v54 = vmul.f32 %v1388_v8, %v765_v14 }
 0x16e   : > { %v1627_v32 = vpop.eup %1626 }
 0x16f   : > { %v780_v17 = vmul.f32 %v764_v48, %v621_v11  ;;  %v767_v53 = vmul.f32 %v1627_v32, %v2134_v29 }
 0x170   : > { %v1629_v51 = vpop.eup %1628 }
 0x171   : > { %v766_v55 = vmul.f32 %v1629_v51, %v2139_v34  ;;  %1442 = vmatprep.mubr.f32.mxu1 %v780_v17  ;;  %v783_v59 = vmul.f32 %v1391_v23, %v767_v53 }
 0x172   : > { %v1631_v56 = vpop.eup %1630  ;;  %1443 = vmatmul.mubr.f32.vlgmr.msra.gmra.mxu1 %v781_v54 }
 0x173   : > { %v782_v57 = vmul.f32 %v766_v55, %v631_v45  ;;  %v769_v20 = vmul.f32 %v1631_v56, %v2142_v38 }
 0x174   : > { %v1633_v58 = vpop.eup %1632 }
 0x175   : > { %v768_v25 = vmul.f32 %v1633_v58, %v2147_v43  ;;  %1445 = vmatprep.mubr.f32.mxu1 %v782_v57  ;;  %v785_v34 = vmul.f32 %v1394_v49, %v769_v20 }
 0x176   : > { %v1635_v60 = vpop.eup %1634  ;;  %1446 = vmatmul.mubr.f32.gmra.mxu1 %v783_v59 }
 0x177   : > { %v784_v62 = vmul.f32 %v768_v25, %v641_v50  ;;  %v771_v63 = vmul.f32 %v1635_v60, %v2150_v47 }
 0x178   : > { %v1637_v29 = vpop.eup %1636 }
 0x179   : > { %v770_v1 = vmul.f32 %v1637_v29, %v2155_v52  ;;  %1448 = vmatprep.mubr.f32.mxu1 %v784_v62  ;;  %v787_v8 = vmul.f32 %v1397_v61, %v771_v63 }
 0x17a   : > { %1449 = vmatmul.mubr.f32.gmra.mxu1 %v785_v34 }
 0x17b   : > { %v786_v5 = vmul.f32 %v770_v1, %v651_v3 }
 0x17d   : > { %1451 = vmatprep.mubr.f32.mxu1 %v786_v5 }
 0x17e   : > { %1452 = vmatmul.mubr.f32.gmra.mxu1 %v787_v8 }
 0x221   : > { %v1432_v38 = vpop.f32.mrf.mxu0 }
 0x223   : > { %v870_v43 = vpop.f32.mrf.mxu0 }
 0x225   : > { %v1435_v10 = vpop.f32.mrf.mxu0 }
 0x227   : > { %v880_v13 = vpop.f32.mrf.mxu0 }
 0x229   : > { %v1438_v15 = vpop.f32.mrf.mxu0 }
 0x22b   : > { %v890_v18 = vpop.f32.mrf.mxu0 }
 0x22d   : > { %v1441_v0 = vpop.f32.mrf.mxu0 }
 0x22f   : > { %v900_v19 = vpop.f32.mrf.mxu0 }
 0x232   : > { %v1444_v21 = vpop.f32.mrf.mxu1 }
 0x234   : > { %v910_v47 = vpop.f32.mrf.mxu1 }
 0x236   : > { %v1447_v2 = vpop.f32.mrf.mxu1 }
 0x238   : > { %v920_v22 = vpop.f32.mrf.mxu1 }
 0x23a   : > { %v1450_v52 = vpop.f32.mrf.mxu1 }
 0x23c   : > { %v930_v24 = vpop.f32.mrf.mxu1  ;;  %952 = sbr.rel (%p1183_p6) target bundleno = 585 (0x249), region = 56 }
 0x23e   : > { %v2181_v11 = vpop.f32.mrf.mxu1 }
 0x240   : > { %v940_v26 = vpop.f32.mrf.mxu1 }
 0x241   : > { %953 = vst [vmem:[#allocation10] sm:$0xff] %v870_v43  ;;  %954 = vst [vmem:[#allocation10 + $0x8] sm:$0xff] %v1432_v38 }
 0x242   : > { %955 = vst [vmem:[#allocation10 + $0x10] sm:$0xff] %v880_v13  ;;  %956 = vst [vmem:[#allocation10 + $0x18] sm:$0xff] %v1435_v10 }
 0x243   : > { %957 = vst [vmem:[#allocation10 + $0x20] sm:$0xff] %v890_v18  ;;  %958 = vst [vmem:[#allocation10 + $0x28] sm:$0xff] %v1438_v15 }
 0x244   : > { %959 = vst [vmem:[#allocation10 + $0x30] sm:$0xff] %v900_v19  ;;  %960 = vst [vmem:[#allocation10 + $0x38] sm:$0xff] %v1441_v0 }
 0x245   : > { %961 = vst [vmem:[#allocation10 + $0x40] sm:$0xff] %v910_v47  ;;  %962 = vst [vmem:[#allocation10 + $0x48] sm:$0xff] %v1444_v21 }
 0x246   : > { %963 = vst [vmem:[#allocation10 + $0x50] sm:$0xff] %v920_v22  ;;  %964 = vst [vmem:[#allocation10 + $0x58] sm:$0xff] %v1447_v2 }
 0x247   : > { %965 = vst [vmem:[#allocation10 + $0x60] sm:$0xff] %v930_v24  ;;  %966 = vst [vmem:[#allocation10 + $0x68] sm:$0xff] %v1450_v52 }
 0x248   : > { %967 = vst [vmem:[#allocation10 + $0x70] sm:$0xff] %v940_v26  ;;  %968 = vst [vmem:[#allocation10 + $0x78] sm:$0xff] %v2181_v11 }
 0x249 PF: > { %p1184_p7 = scmp.eq.s32.totalorder %s1826_s18, 0 }
 0x24b   : > { %972 = sbr.rel (%p1184_p7) target bundleno = 603 (0x25b), region = 60 }
 0x250   : > { %v973_v27 = vld [vmem:[#allocation10] sm:$0xff]  ;;  %v974_v4 = vld [vmem:[#allocation10 + $0x8] sm:$0xff]  ;;  %v975_v28 = vld [vmem:[#allocation10 + $0x10] sm:$0xff] }
 0x251   : > { %v989_v7 = vadd.f32 %v973_v27, %v870_v43  ;;  %v990_v30 = vadd.f32 %v1432_v38, %v974_v4  ;;  %v991_v6 = vadd.f32 %v975_v28, %v880_v13  ;;  %v976_v31 = vld [vmem:[#allocation10 + $0x18] sm:$0xff]  ;;  %v977_v33 = vld [vmem:[#allocation10 + $0x20] sm:$0xff]  ;;  %v978_v35 = vld [vmem:[#allocation10 + $0x28] sm:$0xff] }
 0x252   : > { %v992_v23 = vadd.f32 %v1435_v10, %v976_v31  ;;  %v993_v36 = vadd.f32 %v977_v33, %v890_v18  ;;  %v994_v37 = vadd.f32 %v1438_v15, %v978_v35  ;;  %v979_v9 = vld [vmem:[#allocation10 + $0x30] sm:$0xff]  ;;  %v980_v39 = vld [vmem:[#allocation10 + $0x38] sm:$0xff]  ;;  %v981_v16 = vld [vmem:[#allocation10 + $0x40] sm:$0xff] }
 0x253   : > { %1005 = vst [vmem:[#allocation10] sm:$0xff] %v989_v7  ;;  %1006 = vst [vmem:[#allocation10 + $0x8] sm:$0xff] %v990_v30  ;;  %v995_v40 = vadd.f32 %v979_v9, %v900_v19  ;;  %v996_v12 = vadd.f32 %v1441_v0, %v980_v39  ;;  %v997_v42 = vadd.f32 %v981_v16, %v910_v47  ;;  %v982_v44 = vld [vmem:[#allocation10 + $0x48] sm:$0xff]  ;;  %v983_v45 = vld [vmem:[#allocation10 + $0x50] sm:$0xff] }
 0x254   : > { %1007 = vst [vmem:[#allocation10 + $0x10] sm:$0xff] %v991_v6  ;;  %v984_v41 = vld [vmem:[#allocation10 + $0x58] sm:$0xff]  ;;  %1008 = vst [vmem:[#allocation10 + $0x18] sm:$0xff] %v992_v23  ;;  %v998_v46 = vadd.f32 %v1444_v21, %v982_v44  ;;  %v999_v14 = vadd.f32 %v983_v45, %v920_v22  ;;  %v985_v32 = vld [vmem:[#allocation10 + $0x60] sm:$0xff] }
 0x255   : > { %1009 = vst [vmem:[#allocation10 + $0x20] sm:$0xff] %v993_v36  ;;  %1010 = vst [vmem:[#allocation10 + $0x28] sm:$0xff] %v994_v37  ;;  %v1000_v48 = vadd.f32 %v1447_v2, %v984_v41  ;;  %v986_v49 = vld [vmem:[#allocation10 + $0x68] sm:$0xff]  ;;  %v987_v17 = vld [vmem:[#allocation10 + $0x70] sm:$0xff]  ;;  %v1001_v51 = vadd.f32 %v985_v32, %v930_v24 }
 0x256   : > { %1011 = vst [vmem:[#allocation10 + $0x30] sm:$0xff] %v995_v40  ;;  %1012 = vst [vmem:[#allocation10 + $0x38] sm:$0xff] %v996_v12  ;;  %v1002_v53 = vadd.f32 %v1450_v52, %v986_v49  ;;  %v1003_v54 = vadd.f32 %v987_v17, %v940_v26  ;;  %v988_v55 = vld [vmem:[#allocation10 + $0x78] sm:$0xff] }
 0x257   : > { %1013 = vst [vmem:[#allocation10 + $0x40] sm:$0xff] %v997_v42  ;;  %1014 = vst [vmem:[#allocation10 + $0x48] sm:$0xff] %v998_v46  ;;  %v1004_v56 = vadd.f32 %v2181_v11, %v988_v55 }
 0x258   : > { %1015 = vst [vmem:[#allocation10 + $0x50] sm:$0xff] %v999_v14  ;;  %1016 = vst [vmem:[#allocation10 + $0x58] sm:$0xff] %v1000_v48 }
 0x259   : > { %1017 = vst [vmem:[#allocation10 + $0x60] sm:$0xff] %v1001_v51  ;;  %1018 = vst [vmem:[#allocation10 + $0x68] sm:$0xff] %v1002_v53 }
 0x25a   : > { %1019 = vst [vmem:[#allocation10 + $0x70] sm:$0xff] %v1003_v54  ;;  %1020 = vst [vmem:[#allocation10 + $0x78] sm:$0xff] %v1004_v56 }
 0x25b PF: > { %p1517_p2 = scmp.eq.s32.totalorder %s1954_s5, 3  ;;  %s1843_s18 = smov [#allocation10]  }
 0x25c   : > { %s1030_s7 = sshll.u32 %s1843_s18, 4  ;;  %s1031_s7 = int_to_ptr.vmem [resolvable:$true] %s1030_s7 }
 0x25d   : > { %s1748_s11 = scalar_lea.vmem %s1031_s7, 2048  ;;  %p1755_p4 = scmp.lt.s32.totalorder %s1031_s7, %s1031_s7 }
 0x25e   : > { %p1749_p5 = scmp.ne.s32.totalorder %s1031_s7, %s1748_s11  ;;  %p1756_p9 = scmp.lt.s32.totalorder %s1748_s11, %s1748_s11 }
 0x260   : > { %p1750_p8 = pnand %p1749_p5, %p1517_p2  ;;  %p1757_p11 = por %p1756_p9, %p1755_p4 }
 0x262   : > { %p1751_p3 = pneg %p1750_p8 }
 0x264   : > { %p1758_p12 = pnand %p1757_p11, %p1751_p3 }
 0x266   : > { %1761 = shalt.err (!%p1758_p12)
}
 0x267   : > { %s1844_s23 = smov 128   ;;  %s1845_s24 = smov 8  }
 0x268   : > { %1497 = dma.vmem_to_hbm [thread:$0]  (%p1517_p2), %s1031_s7, 2048, %s2221_s4, [#allocation4], %s1844_s23, %s1844_s23, %s1845_s24  }
 0x269   : > { %1809 = dma.done.wait (%p1517_p2), [#allocation4], 2048  }
 0x26a   : > { %1811 = vsyncadd (%p1517_p2), [#allocation4], 4294965248 }
 0x26b PF: > { %s22_s20 = sadd.s32 1, %s1834_s20   ;;  %s2227_s15 = smov %s1818_s16 }
 0x26c   : > { %p19_p10 = scmp.ge.s32.totalorder %s22_s20, 6   ;;  %s2228_s16 = smov %s1822_s17 }
 0x26d   : > { %s2229_s17 = smov %s1918_s27  ;;  %s2230_s18 = smov %s1830_s19 }
 0x26e   : > { %s2231_s19 = smov %s2233_s21  ;;  %21 = sbr.rel (!%p19_p10) target bundleno = 8 (0x8), region = 112 }
 0x273   :  { %1046 = vsyncpa [#allocation3], 1 }
 0x274   :  { %1048 = vsyncpa [#allocation3 + $0x1], 1 }
 0x275   :  { %1049 = vsyncpa [#allocation6], 1 }
 0x276   :  { %1051 = vsyncpa [#allocation6 + $0x1], 1 }
 0x277   :  { %1052 = vsyncpa [#allocation9], 1 }
 0x278   :  { %1054 = vsyncpa [#allocation9 + $0x1], 1 }
 0x279   :  { %1055 = vsyncpa [#allocation4], 1 }
 0x27a   :  { %1057 = vsyncpa [#allocation4 + $0x1], 1 }

</bundles_post_ra>
